<compile_context>
chip_gen: v7x
topology: tpu7x:2x2x1
jax: 0.10.0
libtpu: 0.0.40
codegen_flags: <defaults>
</compile_context>

<pallas_src>
import functools

import jax
import jax.numpy as jnp
from jax.experimental import pallas as pl
from jax.experimental.pallas import tpu as pltpu

LANES = 128
SUBLANES = 8
SLAB_COLS = SUBLANES * LANES          # 1024 — wide, lane-dense last dim
MAX_BLOCK_ROWS = 1024                 # 1024 x 1024 x 4B = 4 MiB per f32 block


def _dropout_kernel(seed_ref, x_ref, o_ref, *, p, block_rows, block_cols):
    # Per-element global counter: (tile * block_rows + row) * cols + col.
    pid = pl.program_id(0).astype(jnp.uint32)
    shape = x_ref.shape
    row = jax.lax.broadcasted_iota(jnp.int32, shape, 0).astype(jnp.uint32)
    col = jax.lax.broadcasted_iota(jnp.int32, shape, 1).astype(jnp.uint32)
    idx = (pid * jnp.uint32(block_rows) + row) * jnp.uint32(block_cols) + col

    # murmur3 fmix32 of (seed-offset + counter): cheap, VPU-only, well mixed.
    key = seed_ref[0].astype(jnp.uint32)
    z = idx + key * jnp.uint32(0x9E3779B9)
    z = z ^ (z >> 16)
    z = z * jnp.uint32(0x85EBCA6B)
    z = z ^ (z >> 13)
    z = z * jnp.uint32(0xC2B2AE35)
    z = z ^ (z >> 16)

    # Uniform in [0, 1) from the top 24 bits.
    u = (z >> 8).astype(jnp.float32) * jnp.float32(1.0 / (1 << 24))
    keep = u >= jnp.float32(p)

    xv = x_ref[...]
    scale = jnp.asarray(1.0 / (1.0 - p), dtype=xv.dtype)   # keep bf16 math in bf16
    o_ref[...] = jnp.where(keep, xv * scale, jnp.zeros_like(xv))


def dropout(x, seed, *, p=0.5, training=True):
    """Pallas implementation of F.dropout(x, p, training)."""
    if not training or p <= 0.0:
        return x
    if p >= 1.0:
        return jnp.zeros_like(x)

    orig_shape = x.shape
    orig_dtype = x.dtype
    n = x.size

    # Flatten to a lane-dense (rows, 1024) slab; pad only if size is unaligned.
    n_pad = pl.cdiv(n, SLAB_COLS) * SLAB_COLS
    flat = x.reshape(-1)
    padded = n_pad != n
    if padded:
        flat = jnp.pad(flat, (0, n_pad - n))
    rows = n_pad // SLAB_COLS
    x2d = flat.reshape(rows, SLAB_COLS)

    # Row tile: full extent if small, otherwise ~4 MiB blocks (multiple of 8 rows).
    tr = rows if rows <= MAX_BLOCK_ROWS else MAX_BLOCK_ROWS
    grid = (pl.cdiv(rows, tr),)

    seed_arr = jnp.asarray([seed], dtype=jnp.int32)

    out2d = pl.pallas_call(
        functools.partial(
            _dropout_kernel, p=float(p), block_rows=tr, block_cols=SLAB_COLS
        ),
        out_shape=jax.ShapeDtypeStruct((rows, SLAB_COLS), orig_dtype),
        grid_spec=pltpu.PrefetchScalarGridSpec(
            num_scalar_prefetch=1,
            grid=grid,
            in_specs=[pl.BlockSpec((tr, SLAB_COLS), lambda i, seed: (i, 0))],
            out_specs=pl.BlockSpec((tr, SLAB_COLS), lambda i, seed: (i, 0)),
        ),
        # x2d (arg index 1, after the scalar-prefetch seed) may reuse the output buffer.
        input_output_aliases={1: 0},
        compiler_params=pltpu.CompilerParams(
            dimension_semantics=("parallel",),
        ),
    )(seed_arr, x2d)

    out_flat = out2d.reshape(-1)
    if padded:
        out_flat = out_flat[:n]
    return out_flat.reshape(orig_shape)


if __name__ == "__main__":
    key = jax.random.PRNGKey(0)
    # Small NCHW activation tensor, as a conv layer would produce.
    x = jax.random.normal(key, (2, 4, 16, 16), dtype=jnp.float32)

    p = 0.5
    y = dropout(x, seed=0, p=p, training=True)
    y = jax.block_until_ready(y)

    # Shape / dtype preserved.
    assert y.shape == x.shape and y.dtype == x.dtype

    # Roughly a fraction p of elements is dropped.
    dropped = (y == 0)
    drop_frac = float(jnp.mean(dropped.astype(jnp.float32)))
    assert abs(drop_frac - p) < 0.1, drop_frac

    # Surviving elements are exactly x / (1 - p).
    kept = ~dropped
    expected = x / (1.0 - p)
    max_err = float(jnp.max(jnp.abs(jnp.where(kept, y - expected, 0.0))))
    assert max_err < 1e-5, max_err

    # Eval mode is identity.
    y_eval = dropout(x, seed=0, p=p, training=False)
    assert bool(jnp.all(y_eval == x))

    print("KERNEL_OK")
</pallas_src>

<mosaic_0001>
module attributes {stable_mosaic.version = 11 : i64} {
  func.func @_dropout_kernel(%arg0: i32, %arg1: memref<1xi32, #tpu.memory_space<smem>>, %arg2: memref<2x1024xf32, #tpu.memory_space<vmem>>, %arg3: memref<2x1024xf32, #tpu.memory_space<vmem>>) attributes {dimension_semantics = [#tpu.dimension_semantics<parallel>], iteration_bounds = array<i64: 1>, scalar_prefetch = 1 : i64, scratch_operands = 0 : i64, tpu.core_type = #tpu.core_type<tc>, window_params = [{transform_indices = @transform_0, window_bounds = array<i64: 2, 1024>}, {transform_indices = @transform_1, window_bounds = array<i64: 2, 1024>}]} {
    %0 = tpu.iota {dimensions = array<i32: 0>} : vector<2x1024xi32>
    %1 = tpu.iota {dimensions = array<i32: 1>} : vector<2x1024xi32>
    %c2_i32 = arith.constant 2 : i32
    %2 = arith.muli %arg0, %c2_i32 : i32
    %3 = vector.broadcast %2 : i32 to vector<2x1024xi32>
    %4 = arith.addi %3, %0 : vector<2x1024xi32>
    %c1024_i32 = arith.constant 1024 : i32
    %5 = vector.broadcast %c1024_i32 : i32 to vector<2x1024xi32>
    %6 = arith.muli %4, %5 : vector<2x1024xi32>
    %7 = arith.addi %6, %1 : vector<2x1024xi32>
    %c0 = arith.constant 0 : index
    %8 = memref.load %arg1[%c0] : memref<1xi32, #tpu.memory_space<smem>>
    %c-1640531527_i32 = arith.constant -1640531527 : i32
    %9 = arith.muli %8, %c-1640531527_i32 : i32
    %10 = vector.broadcast %9 : i32 to vector<2x1024xi32>
    %11 = arith.addi %7, %10 : vector<2x1024xi32>
    %c16_i32 = arith.constant 16 : i32
    %12 = vector.broadcast %c16_i32 : i32 to vector<2x1024xi32>
    %13 = arith.shrui %11, %12 : vector<2x1024xi32>
    %14 = arith.xori %11, %13 : vector<2x1024xi32>
    %c-2048144789_i32 = arith.constant -2048144789 : i32
    %15 = vector.broadcast %c-2048144789_i32 : i32 to vector<2x1024xi32>
    %16 = arith.muli %14, %15 : vector<2x1024xi32>
    %c13_i32 = arith.constant 13 : i32
    %17 = vector.broadcast %c13_i32 : i32 to vector<2x1024xi32>
    %18 = arith.shrui %16, %17 : vector<2x1024xi32>
    %19 = arith.xori %16, %18 : vector<2x1024xi32>
    %c-1028477387_i32 = arith.constant -1028477387 : i32
    %20 = vector.broadcast %c-1028477387_i32 : i32 to vector<2x1024xi32>
    %21 = arith.muli %19, %20 : vector<2x1024xi32>
    %c16_i32_0 = arith.constant 16 : i32
    %22 = vector.broadcast %c16_i32_0 : i32 to vector<2x1024xi32>
    %23 = arith.shrui %21, %22 : vector<2x1024xi32>
    %24 = arith.xori %21, %23 : vector<2x1024xi32>
    %c8_i32 = arith.constant 8 : i32
    %25 = vector.broadcast %c8_i32 : i32 to vector<2x1024xi32>
    %26 = arith.shrui %24, %25 : vector<2x1024xi32>
    %27 = arith.uitofp %26 : vector<2x1024xi32> to vector<2x1024xf32>
    %cst = arith.constant 5.96046448E-8 : f32
    %28 = vector.broadcast %cst : f32 to vector<2x1024xf32>
    %29 = arith.mulf %27, %28 : vector<2x1024xf32>
    %cst_1 = arith.constant 5.000000e-01 : f32
    %30 = vector.broadcast %cst_1 : f32 to vector<2x1024xf32>
    %31 = arith.cmpf oge, %29, %30 : vector<2x1024xf32>
    %c0_2 = arith.constant 0 : index
    %c0_3 = arith.constant 0 : index
    %32 = vector.load %arg2[%c0_2, %c0_3] : memref<2x1024xf32, #tpu.memory_space<vmem>>, vector<2x1024xf32>
    %cst_4 = arith.constant 2.000000e+00 : f32
    %33 = vector.broadcast %cst_4 : f32 to vector<2x1024xf32>
    %34 = arith.mulf %32, %33 : vector<2x1024xf32>
    %cst_5 = arith.constant 0.000000e+00 : f32
    %35 = vector.broadcast %cst_5 : f32 to vector<2x1024xf32>
    %36 = arith.select %31, %34, %35 : vector<2x1024xi1>, vector<2x1024xf32>
    %c0_6 = arith.constant 0 : index
    %c0_7 = arith.constant 0 : index
    %37 = vector.load %arg3[%c0_6, %c0_7] : memref<2x1024xf32, #tpu.memory_space<vmem>>, vector<2x1024xf32>
    tpu.vector_store %arg3[%c0_6, %c0_7], %36 {strides = array<i32>} : memref<2x1024xf32, #tpu.memory_space<vmem>>, vector<2x1024xf32>,
    return
  }
  func.func @transform_0(%arg0: i32, %arg1: memref<1xi32, #tpu.memory_space<smem>>) -> (i32, i32) {
    %c0_i32 = arith.constant 0 : i32
    %c0_i32_0 = arith.constant 0 : i32
    return %arg0, %c0_i32 : i32, i32
  }
  func.func @transform_1(%arg0: i32, %arg1: memref<1xi32, #tpu.memory_space<smem>>) -> (i32, i32) {
    %c0_i32 = arith.constant 0 : i32
    %c0_i32_0 = arith.constant 0 : i32
    return %arg0, %c0_i32 : i32, i32
  }
}

</mosaic_0001>

<bundles_post_ra>
// kernel: tpu_custom_call.1
= control target key start
LH: loop header
LB: loop body
LE: loop exit
PB: predicated region body
PF: predicated region fallthrough
CT: control target
= control target key end

     0   :  { %8 = vsyncpa [#allocation5], 0  ;;  %s432_s0 = inlined_call_operand.<no memory space> [shape: s32[1], index: 0, kind: input, shape index: {}]   ;;  %s433_s1 = inlined_call_operand.hbm [shape: f32[2,1024], index: 1, kind: input, shape index: {}, may-alias: {1,2}]   ;;  %s434_s2 = inlined_call_operand.hbm [shape: f32[2,1024], index: 2, kind: output, shape index: {}, may-alias: {1,2}]  }
   0x1   :  { %9 = vsyncpa [#allocation6], 0  ;;  %s361_s9 = smov [#allocation4]   ;;  %s313_s13 = scalar_lea.hbm %s433_s1, 256 }
   0x2   :  { %s16_s10 = sshll.u32 %s361_s9, 4  ;;  %p314_p0 = scmp.ne.s32.totalorder %s433_s1, %s313_s13  ;;  %s17_s10 = int_to_ptr.vmem [resolvable:$true] %s16_s10 }
   0x3   :  { %p317_p1 = scmp.lt.u32.totalorder %s313_s13, %s433_s1 }
   0x5   :  { %p319_p2 = pnand %p317_p1, %p314_p0 }
   0x7   :  { %322 = shalt.err (!%p319_p2)
}
   0x8   :  { %s323_s18 = scalar_lea.vmem %s17_s10, 256  ;;  %p328_p4 = scmp.lt.s32.totalorder %s17_s10, %s17_s10 }
   0x9   :  { %p324_p3 = scmp.ne.s32.totalorder %s17_s10, %s323_s18  ;;  %p329_p5 = scmp.lt.s32.totalorder %s323_s18, %s323_s18 }
   0xb   :  { %p330_p6 = por %p329_p5, %p328_p4 }
   0xd   :  { %p331_p7 = pnand %p330_p6, %p324_p3 }
   0xf   :  { %334 = shalt.err (!%p331_p7)
}
  0x10   :  { %19 = dma.hbm_to_vmem [thread:$0]  %s433_s1, 256, %s17_s10, [#allocation5]  }
  0x11   :  { %357 = dma.done.wait [#allocation5], 256  }
  0x12   :  { %358 = vsyncadd [#allocation5], 4294967040  ;;  %v23_v0 = vlaneseq  ;;  %s47_s23 = smul.u32 2654435769, %s432_s0  ;;  %v362_v1 = vmov 1983009808  }
  0x13   :  { %v201_v2 = vunpack.c.l.s4 %v362_v1  ;;  %v193_v19 = vld [vmem:[#allocation4] sm:$0xff]  ;;  %s363_s0 = smov [#allocation7]  }
  0x14   :  { %v24_v3 = vshrl.u32 %v23_v0, 7  ;;  %v26_v4 = vand.u32 127, %v23_v0  ;;  %v48_v5 = vstv %s47_s23  ;;  %v195_v28 = vmul.f32 2.0, %v193_v19  ;;  %s301_s1 = sshll.u32 %s363_s0, 4  ;;  %s302_s1 = int_to_ptr.vmem [resolvable:$true] %s301_s1 }
  0x15   :  { %v202_v6 = vunpack.c.0.s8 %v201_v2  ;;  %s335_s24 = scalar_lea.vmem %s302_s1, 256  ;;  %p340_p9 = scmp.lt.s32.totalorder %s302_s1, %s302_s1 }
  0x16   :  { %v27_v7 = vadd.s32 128, %v26_v4  ;;  %v28_v8 = vadd.s32 256, %v26_v4  ;;  %v29_v9 = vadd.s32 384, %v26_v4  ;;  %v37_v10 = vmul.u32 1024, %v24_v3  ;;  %p336_p8 = scmp.ne.s32.totalorder %s302_s1, %s335_s24  ;;  %p341_p10 = scmp.lt.s32.totalorder %s335_s24, %s335_s24 }
  0x17   :  { %v394_v11 = vsub.s32 %v202_v6, %v24_v3  ;;  %v30_v12 = vadd.s32 512, %v26_v4  ;;  %v31_v13 = vadd.s32 640, %v26_v4  ;;  %v32_v14 = vadd.s32 768, %v26_v4 }
  0x18   :  { %v38_v15 = vadd.s32 %v37_v10, %v26_v4  ;;  %v39_v16 = vadd.s32 %v37_v10, %v27_v7  ;;  %v40_v17 = vadd.s32 %v37_v10, %v28_v8  ;;  %v41_v18 = vadd.s32 %v37_v10, %v29_v9  ;;  %p342_p11 = por %p341_p10, %p340_p9 }
  0x19   :  { %v33_v20 = vadd.s32 896, %v26_v4  ;;  %v42_v21 = vadd.s32 %v37_v10, %v30_v12  ;;  %v43_v22 = vadd.s32 %v37_v10, %v31_v13  ;;  %v44_v23 = vadd.s32 %v37_v10, %v32_v14 }
  0x1a   :  { %v49_v24 = vadd.s32 %v48_v5, %v38_v15  ;;  %v50_v25 = vadd.s32 %v48_v5, %v39_v16  ;;  %v51_v26 = vadd.s32 %v48_v5, %v40_v17  ;;  %v52_v27 = vadd.s32 %v48_v5, %v41_v18  ;;  %p343_p12 = pnand %p342_p11, %p336_p8 }
  0x1b   :  { %v45_v29 = vadd.s32 %v37_v10, %v33_v20  ;;  %v53_v30 = vadd.s32 %v48_v5, %v42_v21  ;;  %v54_v31 = vadd.s32 %v48_v5, %v43_v22  ;;  %v199_v36 = vcombine.high %v195_v28, %v195_v28 }
  0x1c   :  { %v57_v32 = vshrl.u32 %v49_v24, 16  ;;  %v58_v33 = vshrl.u32 %v50_v25, 16  ;;  %v59_v34 = vshrl.u32 %v51_v26, 16  ;;  %v60_v35 = vshrl.u32 %v52_v27, 16 }
  0x1d   :  { %v397_v37 = vrot.slane %v195_v28, %v394_v11  ;;  %v55_v38 = vadd.s32 %v48_v5, %v44_v23  ;;  %v56_v39 = vadd.s32 %v48_v5, %v45_v29  ;;  %v400_v44 = vrot.slane %v199_v36, %v394_v11 }
  0x1e   :  { %v65_v40 = vxor.u32 %v57_v32, %v49_v24  ;;  %v66_v41 = vxor.u32 %v58_v33, %v50_v25  ;;  %v67_v42 = vxor.u32 %v59_v34, %v51_v26  ;;  %v68_v43 = vxor.u32 %v60_v35, %v52_v27 }
  0x1f   :  { %v214_v45 = vcombine.high %v397_v37, %v397_v37  ;;  %v61_v46 = vshrl.u32 %v53_v30, 16  ;;  %v62_v47 = vshrl.u32 %v54_v31, 16  ;;  %v63_v50 = vshrl.u32 %v55_v38, 16 }
  0x20   :  { %v73_v48 = vmul.u32 2246822507, %v65_v40  ;;  %v74_v49 = vmul.u32 2246822507, %v66_v41  ;;  %v64_v51 = vshrl.u32 %v56_v39, 16  ;;  %v215_v54 = vcombine.high %v400_v44, %v400_v44 }
  0x21   :  { %v75_v52 = vmul.u32 2246822507, %v67_v42  ;;  %v76_v53 = vmul.u32 2246822507, %v68_v43  ;;  %v69_v55 = vxor.u32 %v61_v46, %v53_v30  ;;  %v70_v58 = vxor.u32 %v62_v47, %v54_v31 }
  0x22   :  { %v81_v56 = vshrl.u32 %v73_v48, 13  ;;  %v82_v57 = vshrl.u32 %v74_v49, 13  ;;  %v71_v59 = vxor.u32 %v63_v50, %v55_v38  ;;  %v72_v62 = vxor.u32 %v64_v51, %v56_v39 }
  0x23   :  { %v83_v60 = vshrl.u32 %v75_v52, 13  ;;  %v84_v61 = vshrl.u32 %v76_v53, 13  ;;  %v77_v63 = vmul.u32 2246822507, %v69_v55  ;;  %v78_v2 = vmul.u32 2246822507, %v70_v58 }
  0x24   :  { %v89_v0 = vxor.u32 %v81_v56, %v73_v48  ;;  %v90_v1 = vxor.u32 %v82_v57, %v74_v49  ;;  %v79_v3 = vmul.u32 2246822507, %v71_v59  ;;  %v80_v6 = vmul.u32 2246822507, %v72_v62 }
  0x25   :  { %v91_v4 = vxor.u32 %v83_v60, %v75_v52  ;;  %v92_v5 = vxor.u32 %v84_v61, %v76_v53  ;;  %v85_v7 = vshrl.u32 %v77_v63, 13  ;;  %v86_v10 = vshrl.u32 %v78_v2, 13 }
  0x26   :  { %v97_v8 = vmul.u32 3266489909, %v89_v0  ;;  %v98_v9 = vmul.u32 3266489909, %v90_v1  ;;  %v87_v12 = vshrl.u32 %v79_v3, 13  ;;  %v88_v15 = vshrl.u32 %v80_v6, 13 }
  0x27   :  { %v99_v13 = vmul.u32 3266489909, %v91_v4  ;;  %v100_v14 = vmul.u32 3266489909, %v92_v5  ;;  %v93_v16 = vxor.u32 %v85_v7, %v77_v63  ;;  %v94_v19 = vxor.u32 %v86_v10, %v78_v2 }
  0x28   :  { %v105_v17 = vshrl.u32 %v97_v8, 16  ;;  %v106_v18 = vshrl.u32 %v98_v9, 16  ;;  %v95_v20 = vxor.u32 %v87_v12, %v79_v3  ;;  %v96_v23 = vxor.u32 %v88_v15, %v80_v6 }
  0x29   :  { %v107_v21 = vshrl.u32 %v99_v13, 16  ;;  %v108_v22 = vshrl.u32 %v100_v14, 16  ;;  %v101_v24 = vmul.u32 3266489909, %v93_v16  ;;  %v102_v27 = vmul.u32 3266489909, %v94_v19 }
  0x2a   :  { %v113_v25 = vxor.u32 %v105_v17, %v97_v8  ;;  %v114_v26 = vxor.u32 %v106_v18, %v98_v9  ;;  %v103_v28 = vmul.u32 3266489909, %v95_v20  ;;  %v104_v31 = vmul.u32 3266489909, %v96_v23 }
  0x2b   :  { %v115_v29 = vxor.u32 %v107_v21, %v99_v13  ;;  %v116_v30 = vxor.u32 %v108_v22, %v100_v14  ;;  %v109_v32 = vshrl.u32 %v101_v24, 16  ;;  %v110_v35 = vshrl.u32 %v102_v27, 16 }
  0x2c   :  { %v121_v33 = vshrl.u32 %v113_v25, 8  ;;  %v122_v34 = vshrl.u32 %v114_v26, 8  ;;  %v111_v36 = vshrl.u32 %v103_v28, 16  ;;  %v112_v40 = vshrl.u32 %v104_v31, 16 }
  0x2d   :  { %v123_v38 = vshrl.u32 %v115_v29, 8  ;;  %v124_v39 = vshrl.u32 %v116_v30, 8  ;;  %v117_v41 = vxor.u32 %v109_v32, %v101_v24  ;;  %v118_v63 = vxor.u32 %v110_v35, %v102_v27 }
  0x2e   :  { %v129_v42 = vshrl.u32 %v121_v33, 16  ;;  %v130_v43 = vand.u32 65535, %v121_v33  ;;  %v135_v46 = vshrl.u32 %v122_v34, 16  ;;  %v136_v47 = vand.u32 65535, %v122_v34  ;;  %v194_v34 = vld [vmem:[#allocation4 + $0x8] sm:$0xff] }
  0x2f   :  { %v141_v48 = vshrl.u32 %v123_v38, 16  ;;  %v142_v49 = vand.u32 65535, %v123_v38  ;;  %v147_v50 = vshrl.u32 %v124_v39, 16  ;;  %v148_v51 = vand.u32 65535, %v124_v39 }
  0x30   :  { %v131_v52 = vcvt.s32.f32 %v129_v42  ;;  %v133_v53 = vcvt.s32.f32 %v130_v43  ;;  %v137_v55 = vcvt.s32.f32 %v135_v46  ;;  %v139_v56 = vcvt.s32.f32 %v136_v47 }
  0x31   :  { %v143_v57 = vcvt.s32.f32 %v141_v48  ;;  %v145_v58 = vcvt.s32.f32 %v142_v49  ;;  %v149_v59 = vcvt.s32.f32 %v147_v50  ;;  %v151_v60 = vcvt.s32.f32 %v148_v51 }
  0x32   :  { %v132_v61 = vmul.f32 65536.0, %v131_v52  ;;  %v138_v62 = vmul.f32 65536.0, %v137_v55  ;;  %v119_v0 = vxor.u32 %v111_v36, %v103_v28  ;;  %v120_v3 = vxor.u32 %v112_v40, %v104_v31 }
  0x33   :  { %v144_v1 = vmul.f32 65536.0, %v143_v57  ;;  %v150_v2 = vmul.f32 65536.0, %v149_v59  ;;  %v125_v4 = vshrl.u32 %v117_v41, 8  ;;  %v126_v7 = vshrl.u32 %v118_v63, 8 }
  0x34   :  { %v134_v5 = vadd.f32 %v133_v53, %v132_v61  ;;  %v140_v6 = vadd.f32 %v139_v56, %v138_v62  ;;  %v127_v8 = vshrl.u32 %v119_v0, 8  ;;  %v128_v12 = vshrl.u32 %v120_v3, 8 }
  0x35   :  { %v146_v9 = vadd.f32 %v145_v58, %v144_v1  ;;  %v152_v10 = vadd.f32 %v151_v60, %v150_v2  ;;  %v153_v13 = vshrl.u32 %v125_v4, 16  ;;  %v154_v16 = vand.u32 65535, %v125_v4 }
  0x36   :  { %v177_v14 = vmul.f32 5.9604645e-08, %v134_v5  ;;  %v178_v15 = vmul.f32 5.9604645e-08, %v140_v6  ;;  %v159_v17 = vshrl.u32 %v126_v7, 16  ;;  %v160_v21 = vand.u32 65535, %v126_v7 }
  0x37   :  { %v179_v18 = vmul.f32 5.9604645e-08, %v146_v9  ;;  %v180_v19 = vmul.f32 5.9604645e-08, %v152_v10  ;;  %v155_v20 = vcvt.s32.f32 %v153_v13  ;;  %v157_v22 = vcvt.s32.f32 %v154_v16 }
  0x38   :  { %vm185_vm0 = vcmp.ge.f32.partialorder %v177_v14, 0.5  ;;  %vm186_vm1 = vcmp.ge.f32.partialorder %v178_v15, 0.5  ;;  %v161_v23 = vcvt.s32.f32 %v159_v17  ;;  %v163_v32 = vcvt.s32.f32 %v160_v21 }
  0x39   :  { %vm187_vm2 = vcmp.ge.f32.partialorder %v179_v18, 0.5  ;;  %vm188_vm3 = vcmp.ge.f32.partialorder %v180_v19, 0.5  ;;  %v241_v24 = vsel %vm185_vm0, %v397_v37, 0.0  ;;  %v242_v25 = vsel %vm186_vm1, %v214_v45, 0.0 }
  0x3a   :  { %v243_v26 = vsel %vm187_vm2, %v400_v44, 0.0  ;;  %v244_v27 = vsel %vm188_vm3, %v215_v54, 0.0  ;;  %v257_v28 = vcombine.low %v241_v24, %v242_v25  ;;  %v156_v29 = vmul.f32 65536.0, %v155_v20 }
  0x3b   :  { %v258_v30 = vcombine.low %v243_v26, %v244_v27  ;;  %v162_v31 = vmul.f32 65536.0, %v161_v23  ;;  %v165_v33 = vshrl.u32 %v127_v8, 16  ;;  %v166_v38 = vand.u32 65535, %v127_v8 }
  0x3c   :  { %v265_v35 = vrot.slane %v257_v28, %v394_v11  ;;  %v158_v36 = vadd.f32 %v157_v22, %v156_v29  ;;  %v171_v39 = vshrl.u32 %v128_v12, 16  ;;  %v172_v41 = vand.u32 65535, %v128_v12 }
  0x3d   :  { %v272_v37 = vrot.slane %v258_v30, %v394_v11  ;;  %v164_v45 = vadd.f32 %v163_v32, %v162_v31  ;;  %v167_v40 = vcvt.s32.f32 %v165_v33  ;;  %v169_v42 = vcvt.s32.f32 %v166_v38 }
  0x3e   :  { %v173_v44 = vcvt.s32.f32 %v171_v39  ;;  %v181_v54 = vmul.f32 5.9604645e-08, %v158_v36  ;;  %v196_v43 = vmul.f32 2.0, %v194_v34  ;;  %v175_v48 = vcvt.s32.f32 %v172_v41 }
  0x3f   :  { %v273_v46 = vcombine.low %v265_v35, %v272_v37  ;;  %v168_v47 = vmul.f32 65536.0, %v167_v40  ;;  %v182_v49 = vmul.f32 5.9604645e-08, %v164_v45 }
  0x40   :  { %v174_v50 = vmul.f32 65536.0, %v173_v44  ;;  %vm189_vm4 = vcmp.ge.f32.partialorder %v181_v54, 0.5  ;;  %v216_v51 = vcombine.high %v196_v43, %v196_v43  ;;  %v223_v52 = vrot.slane %v196_v43, %v394_v11 }
  0x41   :  { %293 = vst [vmem:[#allocation7] sm:$0xff] %v273_v46  ;;  %v170_v53 = vadd.f32 %v169_v42, %v168_v47  ;;  %vm190_vm5 = vcmp.ge.f32.partialorder %v182_v49, 0.5 }
  0x42   :  { %v176_v55 = vadd.f32 %v175_v48, %v174_v50  ;;  %v230_v56 = vrot.slane %v216_v51, %v394_v11  ;;  %v231_v57 = vcombine.high %v223_v52, %v223_v52  ;;  %v245_v58 = vsel %vm189_vm4, %v223_v52, 0.0 }
  0x43   :  { %v183_v59 = vmul.f32 5.9604645e-08, %v170_v53 }
  0x44   :  { %v184_v60 = vmul.f32 5.9604645e-08, %v176_v55  ;;  %v232_v61 = vcombine.high %v230_v56, %v230_v56  ;;  %v246_v62 = vsel %vm190_vm5, %v231_v57, 0.0 }
  0x45   :  { %vm191_vm6 = vcmp.ge.f32.partialorder %v183_v59, 0.5  ;;  %v274_v63 = vcombine.low %v245_v58, %v246_v62 }
  0x46   :  { %vm192_vm7 = vcmp.ge.f32.partialorder %v184_v60, 0.5  ;;  %v247_v0 = vsel %vm191_vm6, %v230_v56, 0.0 }
  0x47   :  { %v248_v1 = vsel %vm192_vm7, %v232_v61, 0.0  ;;  %v282_v3 = vrot.slane %v274_v63, %v394_v11 }
  0x48   :  { %v275_v2 = vcombine.low %v247_v0, %v248_v1 }
  0x4a   :  { %v289_v4 = vrot.slane %v275_v2, %v394_v11 }
  0x4c   :  { %v290_v5 = vcombine.low %v282_v3, %v289_v4 }
  0x4e   :  { %294 = vst [vmem:[#allocation7 + $0x8] sm:$0xff] %v290_v5 }
  0x4f   :  { %346 = shalt.err (!%p343_p12)
}
  0x50   :  { %s347_s27 = scalar_lea.hbm %s434_s2, 256 }
  0x51   :  { %p348_p13 = scmp.ne.s32.totalorder %s434_s2, %s347_s27  ;;  %p351_p0 = scmp.lt.u32.totalorder %s347_s27, %s434_s2 }
  0x53   :  { %p353_p1 = pnand %p351_p0, %p348_p13 }
  0x55   :  { %356 = shalt.err (!%p353_p1)
}
  0x56   :  { %304 = dma.vmem_to_hbm [thread:$0]  %s302_s1, 256, %s434_s2, [#allocation6]  }
  0x57   :  { %359 = dma.done.wait [#allocation6], 256  }
  0x58   :  { %360 = vsyncadd [#allocation6], 4294967040 }
  0x59   :  { %308 = vsyncpa [#allocation5], 1 }
  0x5a   :  { %309 = vsyncpa [#allocation6], 1 }

</bundles_post_ra>
